<compile_context>
chip_gen: v7x
topology: tpu7x:2x2x1
jax: 0.10.0
libtpu: 0.0.40
codegen_flags: <defaults>
</compile_context>

<pallas_src>
import math
from functools import partial

import jax
import jax.numpy as jnp
from jax.experimental import pallas as pl
from jax.experimental.pallas import tpu as pltpu

NEG_BIG = -9000000000000000.0   # python float literal (NOT a jnp array -> no captured constant)
CPAD = 128                      # lane-dense padded class dimension


def gcn_kernel(x_ref, adj_ref, c12_ref, w_ref, b_ref, out_ref):
    """Whole-batch GCN forward + batch-axis softmax in a single invocation (no grid).

    Shapes (all whole-array blocks resident in VMEM):
      x_ref  : (B*N, F)         flattened (batch, nodes) rows
      adj_ref: (N, N)
      c12_ref: (2, N, N)        stacked correlation matrices (layer1, layer2)
      w_ref  : (3, B*H, CPAD)   [0,:F,:H]=W1, [1,:BH,:BH]=block_diag(W2)*B, [2,:H,:]=Wfc2 (padded)
      b_ref  : (3, CPAD)        row0=tile(b1,B), row1=tile(b2,B), row2=bfc2 (all zero-padded)
      out_ref: (B, CPAD)
    """
    B = out_ref.shape[0]
    N = adj_ref.shape[0]
    F = x_ref.shape[1]
    BH = w_ref.shape[1]
    H = BH // B

    adj = adj_ref[...]
    c12 = c12_ref[...]
    # Batch-invariant masking -- computed exactly once.
    c1m = jnp.where(adj > 0, c12[0], NEG_BIG)
    c2m = jnp.where(adj > 0, c12[1], NEG_BIG)

    wslab = w_ref[...]
    w1 = wslab[0, :F, :H]         # (F, H)
    w2bd = wslab[1, :BH, :BH]     # (B*H, B*H) block-diagonal W2
    wf = wslab[2, :H, :]          # (H, CPAD)

    bslab = b_ref[...]
    b1t = bslab[0:1, :BH]         # (1, B*H)  bias tiled across batch lane-groups
    b2t = bslab[1:2, :BH]         # (1, B*H)
    bf = bslab[2:3, :]            # (1, CPAD)

    # ---- Layer 1 ----
    # Feature transform for the whole batch in one MXU pass.
    s1 = jnp.dot(x_ref[...], w1, preferred_element_type=jnp.float32)          # (B*N, H)
    # Relayout to (N, B*H): per-batch blocks side by side along lanes (cheap XLU shuffle).
    S1 = jnp.concatenate([s1[b * N:(b + 1) * N, :] for b in range(B)], axis=1)  # (N, B*H)
    h = jnp.dot(adj, S1, preferred_element_type=jnp.float32)                  # (N, B*H)
    h = jnp.dot(c1m, h, preferred_element_type=jnp.float32)                   # (N, B*H)
    h1 = jnp.maximum(h + b1t, 0.0)                                            # (N, B*H)

    # ---- Layer 2 ----
    # Block-diagonal W2 keeps everything in the (N, B*H) layout: one matmul, no relayout.
    s2 = jnp.dot(h1, w2bd, preferred_element_type=jnp.float32)                # (N, B*H)
    h = jnp.dot(adj, s2, preferred_element_type=jnp.float32)
    h = jnp.dot(c2m, h, preferred_element_type=jnp.float32)
    h2 = jnp.maximum(h + b2t, 0.0)                                            # (N, B*H)

    # ---- Mean over nodes + single fc2 matmul for the whole batch ----
    m = jnp.mean(h2, axis=0, keepdims=True)                                   # (1, B*H)
    mB = jnp.concatenate([m[:, b * H:(b + 1) * H] for b in range(B)], axis=0)  # (B, H)
    logits = jnp.dot(mB, wf, preferred_element_type=jnp.float32) + bf         # (B, CPAD)

    # ---- softmax over the batch axis (dim=0), fused into the same kernel ----
    mx = jnp.max(logits, axis=0, keepdims=True)
    e = jnp.exp(logits - mx)
    inv = pl.reciprocal(jnp.sum(e, axis=0, keepdims=True), approx=False)      # exact 1/x
    out_ref[...] = e * inv


def prepare_packed_params(params, batch_size):
    """One-time packing of weights/biases into DMA-friendly slabs (hoisted off the per-call path)."""
    F, H = params["w1"].shape
    C = params["wf"].shape[1]
    B = batch_size
    BH = B * H
    assert BH >= F and BH >= H and C <= CPAD

    # Weight slab: (3, B*H, CPAD)
    wslab = jnp.zeros((3, BH, CPAD), jnp.float32)
    wslab = wslab.at[0, :F, :H].set(params["w1"])
    # block-diagonal W2 (exact: extra zero terms in the MXU contraction do not change results)
    w2bd = jnp.kron(jnp.eye(B, dtype=jnp.float32), params["w2"])
    wslab = wslab.at[1, :BH, :BH].set(w2bd)
    wslab = wslab.at[2, :H, :C].set(params["wf"])

    # Bias slab: (3, CPAD), biases pre-tiled to the lane-batched (N, B*H) layout.
    bslab = jnp.zeros((3, CPAD), jnp.float32)
    bslab = bslab.at[0, :BH].set(jnp.tile(params["b1"][0], B))
    bslab = bslab.at[1, :BH].set(jnp.tile(params["b2"][0], B))
    bslab = bslab.at[2, :C].set(params["bf"][0])

    # Correlation slab: (2, N, N)
    c12 = jnp.stack([params["c1"], params["c2"]], axis=0)

    return {"c12": c12, "wslab": wslab, "bslab": bslab}


@partial(jax.jit, static_argnames=("n_class",))
def gcn_forward(x, adj, c12, wslab, bslab, *, n_class):
    B, N, F = x.shape
    x2 = x.reshape(B * N, F)   # layout-identity reshape, free in XLA

    vmem = pl.BlockSpec(memory_space=pltpu.MemorySpace.VMEM)
    probs_pad = pl.pallas_call(
        gcn_kernel,
        out_shape=jax.ShapeDtypeStruct((B, CPAD), jnp.float32),
        in_specs=[vmem] * 5,
        out_specs=vmem,
    )(x2, adj, c12, wslab, bslab)

    return probs_pad[:, None, :n_class]       # (B, 1, C), matching the torch output shape


def gcn_reference(x, adj, p):
    """Pure-JAX reference of the exact PyTorch forward (unfolded op order)."""
    def conv(inp, w, corr, bias):
        support = jnp.matmul(inp, w)
        out = jnp.matmul(adj, support)
        c = jnp.where(adj > 0, corr, NEG_BIG)
        out = jnp.matmul(c, out)
        return out + bias

    h = jax.nn.relu(conv(x, p["w1"], p["c1"], p["b1"]))
    h = jax.nn.relu(conv(h, p["w2"], p["c2"], p["b2"]))
    m = jnp.mean(h, axis=1, keepdims=True)
    y = jnp.matmul(m, p["wf"]) + p["bf"]
    return jax.nn.softmax(y, axis=0)


def init_params(key, in_features, n_hid, n_class, img_size):
    N = img_size ** 2
    ks = jax.random.split(key, 10)
    stdv = 1.0 / math.sqrt(n_hid)        # GraphConvolution.reset_parameters
    stdv_fc = 1.0 / math.sqrt(n_hid)     # torch Linear default bound for fc2
    u = lambda k, shp, b: jax.random.uniform(k, shp, jnp.float32, -b, b)
    return {
        "w1": u(ks[0], (in_features, n_hid), stdv),
        "b1": u(ks[1], (1, n_hid), stdv),
        "c1": u(ks[2], (N, N), 1.0),
        "w2": u(ks[3], (n_hid, n_hid), stdv),
        "b2": u(ks[4], (1, n_hid), stdv),
        "c2": u(ks[5], (N, N), 1.0),
        "wf": u(ks[6], (n_hid, n_class), stdv_fc),   # fc2 weight, stored as (in, out)
        "bf": u(ks[7], (1, n_class), stdv_fc),
    }


if __name__ == "__main__":
    B, img_size, in_features, n_hid, n_class = 2, 4, 8, 32, 10
    N = img_size ** 2

    key = jax.random.PRNGKey(0)
    kx, kadj, kp = jax.random.split(key, 3)

    x = jax.random.normal(kx, (B, N, in_features), jnp.float32)
    # strictly-positive adjacency keeps the (unnormalized) -9e15 masking numerically tame,
    # while the `where(adj > 0, ...)` path is still computed exactly as in the module.
    adj = jax.random.uniform(kadj, (N, N), jnp.float32, 0.1, 1.0)
    params = init_params(kp, in_features, n_hid, n_class, img_size)

    # One-time packing (padding / stacking / block-diag) outside the per-call path.
    packed = prepare_packed_params(params, B)

    out = gcn_forward(x, adj, packed["c12"], packed["wslab"], packed["bslab"],
                      n_class=n_class)
    out = jax.block_until_ready(out)

    ref = gcn_reference(x, adj, params)
    assert out.shape == (B, 1, n_class)
    assert jnp.allclose(out, ref, rtol=1e-3, atol=1e-5), "mismatch vs pure-JAX reference"

    print("KERNEL_OK")
</pallas_src>

<mosaic_0001>
module attributes {stable_mosaic.version = 11 : i64} {
  func.func @gcn_kernel(%arg0: memref<32x8xf32, #tpu.memory_space<vmem>>, %arg1: memref<16x16xf32, #tpu.memory_space<vmem>>, %arg2: memref<2x16x16xf32, #tpu.memory_space<vmem>>, %arg3: memref<3x64x128xf32, #tpu.memory_space<vmem>>, %arg4: memref<3x128xf32, #tpu.memory_space<vmem>>, %arg5: memref<2x128xf32, #tpu.memory_space<vmem>>) attributes {dimension_semantics = [], scalar_prefetch = 0 : i64, scratch_operands = 0 : i64, tpu.core_type = #tpu.core_type<tc>} {
    %c0 = arith.constant 0 : index
    %c0_0 = arith.constant 0 : index
    %0 = vector.load %arg1[%c0, %c0_0] : memref<16x16xf32, #tpu.memory_space<vmem>>, vector<16x16xf32>
    %c0_1 = arith.constant 0 : index
    %c0_2 = arith.constant 0 : index
    %c0_3 = arith.constant 0 : index
    %1 = vector.load %arg2[%c0_1, %c0_2, %c0_3] : memref<2x16x16xf32, #tpu.memory_space<vmem>>, vector<2x16x16xf32>
    %cst = arith.constant 0.000000e+00 : f32
    %2 = vector.broadcast %cst : f32 to vector<16x16xf32>
    %3 = arith.cmpf ogt, %0, %2 : vector<16x16xf32>
    %4 = vector.extract_strided_slice %1 {offsets = [0, 0, 0], sizes = [1, 16, 16], strides = [1, 1, 1]} : vector<2x16x16xf32> to vector<1x16x16xf32>
    %5 = vector.shape_cast %4 : vector<1x16x16xf32> to vector<16x16xf32>
    %cst_4 = arith.constant -9.000000e+15 : f32
    %6 = vector.broadcast %cst_4 : f32 to vector<16x16xf32>
    %7 = arith.select %3, %5, %6 : vector<16x16xi1>, vector<16x16xf32>
    %cst_5 = arith.constant 0.000000e+00 : f32
    %8 = vector.broadcast %cst_5 : f32 to vector<16x16xf32>
    %9 = arith.cmpf ogt, %0, %8 : vector<16x16xf32>
    %10 = vector.extract_strided_slice %1 {offsets = [1, 0, 0], sizes = [1, 16, 16], strides = [1, 1, 1]} : vector<2x16x16xf32> to vector<1x16x16xf32>
    %11 = vector.shape_cast %10 : vector<1x16x16xf32> to vector<16x16xf32>
    %cst_6 = arith.constant -9.000000e+15 : f32
    %12 = vector.broadcast %cst_6 : f32 to vector<16x16xf32>
    %13 = arith.select %9, %11, %12 : vector<16x16xi1>, vector<16x16xf32>
    %c0_7 = arith.constant 0 : index
    %c0_8 = arith.constant 0 : index
    %c0_9 = arith.constant 0 : index
    %14 = vector.load %arg3[%c0_7, %c0_8, %c0_9] : memref<3x64x128xf32, #tpu.memory_space<vmem>>, vector<3x64x128xf32>
    %15 = vector.extract_strided_slice %14 {offsets = [0, 0, 0], sizes = [1, 8, 32], strides = [1, 1, 1]} : vector<3x64x128xf32> to vector<1x8x32xf32>
    %16 = vector.shape_cast %15 : vector<1x8x32xf32> to vector<8x32xf32>
    %17 = vector.extract_strided_slice %14 {offsets = [1, 0, 0], sizes = [1, 64, 64], strides = [1, 1, 1]} : vector<3x64x128xf32> to vector<1x64x64xf32>
    %18 = vector.shape_cast %17 : vector<1x64x64xf32> to vector<64x64xf32>
    %19 = vector.extract_strided_slice %14 {offsets = [2, 0, 0], sizes = [1, 32, 128], strides = [1, 1, 1]} : vector<3x64x128xf32> to vector<1x32x128xf32>
    %20 = vector.shape_cast %19 : vector<1x32x128xf32> to vector<32x128xf32>
    %c0_10 = arith.constant 0 : index
    %c0_11 = arith.constant 0 : index
    %21 = vector.load %arg4[%c0_10, %c0_11] : memref<3x128xf32, #tpu.memory_space<vmem>>, vector<3x128xf32>
    %22 = vector.extract_strided_slice %21 {offsets = [0, 0], sizes = [1, 64], strides = [1, 1]} : vector<3x128xf32> to vector<1x64xf32>
    %23 = vector.extract_strided_slice %21 {offsets = [1, 0], sizes = [1, 64], strides = [1, 1]} : vector<3x128xf32> to vector<1x64xf32>
    %24 = vector.extract_strided_slice %21 {offsets = [2, 0], sizes = [1, 128], strides = [1, 1]} : vector<3x128xf32> to vector<1x128xf32>
    %c0_12 = arith.constant 0 : index
    %c0_13 = arith.constant 0 : index
    %25 = vector.load %arg0[%c0_12, %c0_13] : memref<32x8xf32, #tpu.memory_space<vmem>>, vector<32x8xf32>
    %cst_14 = arith.constant dense<0.000000e+00> : vector<32x32xf32>
    %26 = tpu.matmul %25, %16, %cst_14 {dimension_numbers = #tpu.dot_dimension_numbers<[1], [0], [0], [1], [0, 0, 1, 1], [], []>} : vector<32x8xf32>, vector<8x32xf32>, vector<32x32xf32> -> vector<32x32xf32>
    %27 = vector.extract_strided_slice %26 {offsets = [0, 0], sizes = [16, 32], strides = [1, 1]} : vector<32x32xf32> to vector<16x32xf32>
    %28 = vector.extract_strided_slice %26 {offsets = [16, 0], sizes = [16, 32], strides = [1, 1]} : vector<32x32xf32> to vector<16x32xf32>
    %29 = tpu.concatenate %27, %28 in 1 : vector<16x32xf32>, vector<16x32xf32> -> vector<16x64xf32>
    %cst_15 = arith.constant dense<0.000000e+00> : vector<16x64xf32>
    %30 = tpu.matmul %0, %29, %cst_15 {dimension_numbers = #tpu.dot_dimension_numbers<[1], [0], [0], [1], [0, 0, 1, 1], [], []>} : vector<16x16xf32>, vector<16x64xf32>, vector<16x64xf32> -> vector<16x64xf32>
    %cst_16 = arith.constant dense<0.000000e+00> : vector<16x64xf32>
    %31 = tpu.matmul %7, %30, %cst_16 {dimension_numbers = #tpu.dot_dimension_numbers<[1], [0], [0], [1], [0, 0, 1, 1], [], []>} : vector<16x16xf32>, vector<16x64xf32>, vector<16x64xf32> -> vector<16x64xf32>
    %32 = vector.broadcast %22 : vector<1x64xf32> to vector<16x64xf32>
    %33 = arith.addf %31, %32 : vector<16x64xf32>
    %cst_17 = arith.constant 0.000000e+00 : f32
    %34 = vector.broadcast %cst_17 : f32 to vector<16x64xf32>
    %35 = arith.maximumf %33, %34 : vector<16x64xf32>
    %cst_18 = arith.constant dense<0.000000e+00> : vector<16x64xf32>
    %36 = tpu.matmul %35, %18, %cst_18 {dimension_numbers = #tpu.dot_dimension_numbers<[1], [0], [0], [1], [0, 0, 1, 1], [], []>} : vector<16x64xf32>, vector<64x64xf32>, vector<16x64xf32> -> vector<16x64xf32>
    %cst_19 = arith.constant dense<0.000000e+00> : vector<16x64xf32>
    %37 = tpu.matmul %0, %36, %cst_19 {dimension_numbers = #tpu.dot_dimension_numbers<[1], [0], [0], [1], [0, 0, 1, 1], [], []>} : vector<16x16xf32>, vector<16x64xf32>, vector<16x64xf32> -> vector<16x64xf32>
    %cst_20 = arith.constant dense<0.000000e+00> : vector<16x64xf32>
    %38 = tpu.matmul %13, %37, %cst_20 {dimension_numbers = #tpu.dot_dimension_numbers<[1], [0], [0], [1], [0, 0, 1, 1], [], []>} : vector<16x16xf32>, vector<16x64xf32>, vector<16x64xf32> -> vector<16x64xf32>
    %39 = vector.broadcast %23 : vector<1x64xf32> to vector<16x64xf32>
    %40 = arith.addf %38, %39 : vector<16x64xf32>
    %cst_21 = arith.constant 0.000000e+00 : f32
    %41 = vector.broadcast %cst_21 : f32 to vector<16x64xf32>
    %42 = arith.maximumf %40, %41 : vector<16x64xf32>
    %cst_22 = arith.constant dense<0.000000e+00> : vector<64xf32>
    %43 = vector.multi_reduction <add>, %42, %cst_22 [0] : vector<16x64xf32> to vector<64xf32>
    %44 = vector.shape_cast %43 : vector<64xf32> to vector<1x64xf32>
    %cst_23 = arith.constant 1.600000e+01 : f32
    %45 = vector.broadcast %cst_23 : f32 to vector<1x64xf32>
    %46 = arith.divf %44, %45 : vector<1x64xf32>
    %47 = vector.extract_strided_slice %46 {offsets = [0, 0], sizes = [1, 32], strides = [1, 1]} : vector<1x64xf32> to vector<1x32xf32>
    %48 = vector.extract_strided_slice %46 {offsets = [0, 32], sizes = [1, 32], strides = [1, 1]} : vector<1x64xf32> to vector<1x32xf32>
    %49 = tpu.concatenate %47, %48 in 0 : vector<1x32xf32>, vector<1x32xf32> -> vector<2x32xf32>
    %cst_24 = arith.constant dense<0.000000e+00> : vector<2x128xf32>
    %50 = tpu.matmul %49, %20, %cst_24 {dimension_numbers = #tpu.dot_dimension_numbers<[1], [0], [0], [1], [0, 0, 1, 1], [], []>} : vector<2x32xf32>, vector<32x128xf32>, vector<2x128xf32> -> vector<2x128xf32>
    %51 = vector.broadcast %24 : vector<1x128xf32> to vector<2x128xf32>
    %52 = arith.addf %50, %51 : vector<2x128xf32>
    %cst_25 = arith.constant dense<0xFF800000> : vector<128xf32>
    %53 = vector.multi_reduction <maximumf>, %52, %cst_25 [0] : vector<2x128xf32> to vector<128xf32>
    %54 = vector.shape_cast %53 : vector<128xf32> to vector<1x128xf32>
    %55 = vector.broadcast %54 : vector<1x128xf32> to vector<2x128xf32>
    %56 = arith.subf %52, %55 : vector<2x128xf32>
    %57 = math.exp %56 : vector<2x128xf32>
    %cst_26 = arith.constant dense<0.000000e+00> : vector<128xf32>
    %58 = vector.multi_reduction <add>, %57, %cst_26 [0] : vector<2x128xf32> to vector<128xf32>
    %59 = vector.shape_cast %58 : vector<128xf32> to vector<1x128xf32>
    %60 = tpu.reciprocal %59 : vector<1x128xf32> -> vector<1x128xf32>
    %61 = vector.broadcast %60 : vector<1x128xf32> to vector<2x128xf32>
    %62 = arith.mulf %57, %61 : vector<2x128xf32>
    %c0_27 = arith.constant 0 : index
    %c0_28 = arith.constant 0 : index
    %63 = vector.load %arg5[%c0_27, %c0_28] : memref<2x128xf32, #tpu.memory_space<vmem>>, vector<2x128xf32>
    tpu.vector_store %arg5[%c0_27, %c0_28], %62 {strides = array<i32>} : memref<2x128xf32, #tpu.memory_space<vmem>>, vector<2x128xf32>,
    return
  }
}

</mosaic_0001>

<bundles_post_ra>
// kernel: gcn_forward.1
= control target key start
LH: loop header
LB: loop body
LE: loop exit
PB: predicated region body
PF: predicated region fallthrough
CT: control target
= control target key end

     0   :  { %10 = vsyncpa [#allocation3], 0  ;;  %s1077_s0 = inlined_call_operand.vmem [shape: f32[32,8], index: 0, kind: input, shape index: {}]   ;;  %s1078_s1 = inlined_call_operand.vmem [shape: f32[16,16], index: 1, kind: input, shape index: {}]   ;;  %s1079_s2 = inlined_call_operand.vmem [shape: f32[2,16,16], index: 2, kind: input, shape index: {}]   ;;  %s1080_s3 = inlined_call_operand.hbm [shape: f32[3,64,128], index: 3, kind: input, shape index: {}]   ;;  %s1081_s4 = inlined_call_operand.vmem [shape: f32[3,128], index: 4, kind: input, shape index: {}]   ;;  %s1082_s5 = inlined_call_operand.hbm [shape: f32[2,128], index: 5, kind: output, shape index: {}]  }
   0x1   :  { %11 = vsyncpa [#allocation4], 0  ;;  %s938_s18 = smov [#allocation2]   ;;  %s890_s22 = scalar_lea.hbm %s1080_s3, 3072 }
   0x2   :  { %s23_s19 = sshll.u32 %s938_s18, 4  ;;  %p891_p0 = scmp.ne.s32.totalorder %s1080_s3, %s890_s22  ;;  %s24_s19 = int_to_ptr.vmem [resolvable:$true] %s23_s19 }
   0x3   :  { %p894_p1 = scmp.lt.u32.totalorder %s890_s22, %s1080_s3 }
   0x5   :  { %p896_p2 = pnand %p894_p1, %p891_p0 }
   0x7   :  { %899 = shalt.err (!%p896_p2)
}
   0x8   :  { %s900_s27 = scalar_lea.vmem %s24_s19, 3072  ;;  %p905_p4 = scmp.lt.s32.totalorder %s24_s19, %s24_s19 }
   0x9   :  { %p901_p3 = scmp.ne.s32.totalorder %s24_s19, %s900_s27  ;;  %p906_p5 = scmp.lt.s32.totalorder %s900_s27, %s900_s27 }
   0xb   :  { %p907_p6 = por %p906_p5, %p905_p4 }
   0xd   :  { %p908_p7 = pnand %p907_p6, %p901_p3 }
   0xf   :  { %911 = shalt.err (!%p908_p7)
}
  0x10   :  { %s939_s28 = smov 128   ;;  %s940_s29 = smov 8  }
  0x11   :  { %29 = dma.hbm_to_vmem [thread:$0]  %s1080_s3, 3072, %s24_s19, [#allocation3], %s939_s28, %s939_s28, %s940_s29  }
  0x12   :  { %934 = dma.done.wait [#allocation3], 3072  }
  0x13   :  { %935 = vsyncadd [#allocation3], 4294964224  ;;  %vm65_vm0 = vcmask 64512   ;;  %v47_v0 = vld [vmem:[#allocation2] sm:$0xff]  ;;  %v62_v2 = vld [vmem:[%s1077_s0 + $0x8] sm:$0xff]  ;;  %vm174_vm1 = vcmask 130048   ;;  %v256_v37 = vlaneseq }
  0x14   :  { %v61_v1 = vld [vmem:[%s1077_s0] sm:$0xff]  ;;  %768 = vmatprep.subr.mxu0 %v47_v0  ;;  %v63_v3 = vld [vmem:[%s1077_s0 + $0x10] sm:$0xff]  ;;  %v64_v4 = vld [vmem:[%s1077_s0 + $0x18] sm:$0xff]  ;;  %s941_s16 = smov 32   ;;  %vm171_vm2 = vcmask 261120   ;;  %vm343_vm5 = vcmask 523264  }
  0x15   :  { %770 = vmatprep.mubr.msk.f32.mxu0 %vm65_vm0, %v61_v1  ;;  %769 = vmatpush3.msra.mxu0 %v47_v0  ;;  %v1004_v7 = vld [vmem:[%s1078_s1] sm:$0xff]  ;;  %v1013_v17 = vld [vmem:[%s1078_s1 + $0x8] sm:$0xff]  ;;  %v50_v22 = vld [vmem:[#allocation2 + $0x50] sm:$0xff]  ;;  %v1031_v38 = vshrl.u32 %v256_v37, 7  ;;  %v942_v61 = vmov 0.0|0.0   ;;  %vm943_vm6 = vmmov 0  }
  0x16   :  { %771 = vmatmul.mubr.msk.f32.vlgmr.msra.gmra.mrb[0].mxu0 %vm65_vm0, %v62_v2  ;;  %780 = vmatprep.mubr.msk.f32.mxu1 %vm174_vm1, %v1004_v7  ;;  %vm41_vm3 = vcmp.gt.f32.partialorder %v1004_v7, 0.0  ;;  %v37_v18 = vld [vmem:[%s1079_s2] sm:$0xff]  ;;  %v49_v21 = vld [vmem:[#allocation2 + $0x48] sm:$0xff]  ;;  %v51_v24 = vld [vmem:[#allocation2 + $0x58] sm:$0xff]  ;;  %vm42_vm4 = vcmp.gt.f32.partialorder %v1013_v17, 0.0  ;;  %vm602_vm7 = vcmask 1040384  }
  0x17   :  { %773 = vmatprep.mubr.msk.f32.mxu0 %vm65_vm0, %v63_v3  ;;  %v43_v19 = vsel %vm41_vm3, %v37_v18, -9e+15  ;;  %v48_v20 = vld [vmem:[#allocation2 + $0x40] sm:$0xff]  ;;  %v846_v25 = vpack.c.bf16 %v51_v24, %v50_v22  ;;  %v53_v27 = vld [vmem:[#allocation2 + $0x68] sm:$0xff]  ;;  %v54_v34 = vld [vmem:[#allocation2 + $0x70] sm:$0xff]  ;;  %v258_v39 = vsub.s32 0, %v1031_v38 }
  0x18   :  { %v842_v23 = vpack.c.bf16 %v49_v21, %v48_v20  ;;  %v52_v26 = vld [vmem:[#allocation2 + $0x60] sm:$0xff]  ;;  %v38_v32 = vld [vmem:[%s1079_s2 + $0x8] sm:$0xff]  ;;  %v55_v35 = vld [vmem:[#allocation2 + $0x78] sm:$0xff]  ;;  %v502_v1 = vsub.s32 1, %v1031_v38  ;;  %v606_v22 = vsub.s32 2, %v1031_v38  ;;  %vm681_vm8 = vcmask 1041408  }
  0x19   :  { %v850_v28 = vpack.c.bf16 %v53_v27, %v52_v26  ;;  %v44_v33 = vsel %vm42_vm4, %v38_v32, -9e+15  ;;  %v854_v36 = vpack.c.bf16 %v55_v35, %v54_v34  ;;  %v1037_v40 = vld [vmem:[%s1081_s4] sm:$0x7]  ;;  %v39_v51 = vld [vmem:[%s1079_s2 + $0x10] sm:$0xff]  ;;  %v40_v56 = vld [vmem:[%s1079_s2 + $0x18] sm:$0xff] }
  0x1a   :  { %774 = vmatmul.mubr.msk.f32.gmra.mrb[2].mxu0 %vm65_vm0, %v64_v4  ;;  %843 = vmatprep.subr.bf16.mxu0 %v842_v23  ;;  %v259_v41 = vrot.slane %v1037_v40, %v258_v39  ;;  %v45_v52 = vsel %vm41_vm3, %v39_v51, -9e+15  ;;  %v46_v57 = vsel %vm42_vm4, %v40_v56, -9e+15  ;;  %v56_v58 = vld [vmem:[#allocation2 + $0x80] sm:$0xff]  ;;  %v57_v59 = vld [vmem:[#allocation2 + $0x88] sm:$0xff]  ;;  %v503_v2 = vrot.slane %v1037_v40, %v502_v1 }
  0x1b   :  { %845 = vmatpush3.bf16.msra.mxu0 %v842_v23  ;;  %v58_v60 = vld [vmem:[#allocation2 + $0x90] sm:$0xff]  ;;  %v867_v62 = vpack.c.bf16 %v57_v59, %v56_v58  ;;  %v59_v63 = vld [vmem:[#allocation2 + $0x98] sm:$0xff]  ;;  %s945_s2 = smov 96   ;;  %v607_v23 = vrot.slane %v1037_v40, %v606_v22  ;;  %s946_s26 = smov [#allocation5]  }
  0x1c   :  { %847 = vmatprep.subr.bf16.mxu0 %v846_v25  ;;  %v870_v0 = vpack.c.bf16 %v59_v63, %v58_v60  ;;  %s708_s27 = sshll.u32 %s946_s26, 4  ;;  %s709_s27 = int_to_ptr.vmem [resolvable:$true] %s708_s27 }
  0x1d   :  { %s912_s28 = scalar_lea.vmem %s709_s27, 32  ;;  %p917_p9 = scmp.lt.s32.totalorder %s709_s27, %s709_s27 }
  0x1e   :  { %p913_p8 = scmp.ne.s32.totalorder %s709_s27, %s912_s28  ;;  %p918_p10 = scmp.lt.s32.totalorder %s912_s28, %s912_s28 }
  0x1f   :  { %849 = vmatpush3.bf16.msra.mxu0 %v846_v25 }
  0x20   :  { %851 = vmatprep.subr.bf16.mxu0 %v850_v28  ;;  %p919_p11 = por %p918_p10, %p917_p9 }
  0x22   :  { %p920_p12 = pnand %p919_p11, %p913_p8 }
  0x23   :  { %853 = vmatpush3.bf16.msra.mxu0 %v850_v28 }
  0x24   :  { %855 = vmatprep.subr.bf16.mxu0 %v854_v36 }
  0x27   :  { %857 = vmatpush3.bf16.msra.mxu0 %v854_v36 }
  0xe9   :  { %v772_v5 = vpop.f32.mrb[0].mxu0 }
  0xea   :  { %v144_v6 = vpop.f32.mrb[1].mxu0 }
  0xed   :  { %v775_v8 = vpop.f32.mrb[2].mxu0 }
  0xee   :  { %v154_v9 = vpop.f32.mrb[3].mxu0 }
  0xef   :  { %v881_v10 = vpack.i.bf16 %v775_v8, %v154_v9 }
  0xf1   :  { %882 = vrot.lane.b32.xlu0 %v881_v10, %s941_s16 }
 0x163   :  { %v883_v11 = vpop.permute.xlu0 %882 }
 0x164   :  { %v885_v12 = vunpack.i.h.bf16 %v883_v11  ;;  %v884_v13 = vunpack.i.l.bf16 %v883_v11 }
 0x166   :  { %v172_v14 = vsel %vm171_vm2, %v144_v6, %v884_v13  ;;  %v173_v15 = vsel %vm171_vm2, %v772_v5, %v885_v12  ;;  %v944_v13 = vmov 0.0  }
 0x167   :  { %v834_v16 = vpack.c.bf16 %v173_v15, %v172_v14 }
 0x169   :  { %835 = vmatprep.subr.bf16.mxu1 %v834_v16 }
 0x16a   :  { %837 = vmatpush3.bf16.msra.mxu1 %v834_v16 }
 0x16d   :  { %781 = vmatmul.mubr.msk.f32.vlgmr.msra.gmra.mrb[0].mxu1 %vm174_vm1, %v1013_v17 }
 0x16e   :  { %787 = vmatprep.mubr.msk.f32.mxu1 %vm174_vm1, %v43_v19 }
 0x240   :  { %v782_v29 = vpop.f32.mrb[0].mxu1 }
 0x241   :  { %v247_v30 = vpop.f32.mrb[1].mxu1 }
 0x242   :  { %v838_v31 = vpack.c.bf16 %v782_v29, %v247_v30 }
 0x244   :  { %839 = vmatprep.subr.bf16.mxu1 %v838_v31 }
 0x245   :  { %841 = vmatpush3.bf16.msra.mxu1 %v838_v31 }
 0x248   :  { %788 = vmatmul.mubr.msk.f32.vlgmr.msra.gmra.mrb[2].mxu1 %vm174_vm1, %v44_v33 }
 0x249   :  { %820 = vmatprep.mubr.msk.f32.mxu1 %vm174_vm1, %v45_v52 }
 0x31b   :  { %v789_v42 = vpop.f32.mrb[2].mxu1 }
 0x31c   :  { %v338_v43 = vadd.f32 %v789_v42, %v259_v41  ;;  %v332_v44 = vpop.f32.mrb[3].mxu1 }
 0x31d   :  { %v333_v45 = vadd.f32 %v332_v44, %v259_v41 }
 0x31e   :  { %v342_v47 = vmax.f32 %v338_v43, 0.0 }
 0x31f   :  { %v341_v46 = vmax.f32 %v333_v45, 0.0 }
 0x321   :  { %806 = vmatprep.mubr.msk.f32.mxu0 %vm343_vm5, %v341_v46 }
 0x322   :  { %807 = vmatmul.mubr.msk.f32.vlgmr.msra.gmra.mrb[4].mxu0 %vm343_vm5, %v342_v47 }
 0x323   :  { %813 = vmatprep.mubr.msk.f32.mxu0 %vm174_vm1, %v1004_v7 }
 0x3f5   :  { %v808_v48 = vpop.f32.mrb[4].mxu0 }
 0x3f6   :  { %v416_v49 = vpop.f32.mrb[5].mxu0 }
 0x3f7   :  { %v858_v50 = vpack.c.bf16 %v808_v48, %v416_v49 }
 0x3f9   :  { %859 = vmatprep.subr.bf16.mxu0 %v858_v50 }
 0x3fa   :  { %861 = vmatpush3.bf16.msra.mxu0 %v858_v50 }
 0x3fd   :  { %814 = vmatmul.mubr.msk.f32.vlgmr.msra.gmra.mrb[6].mxu0 %vm174_vm1, %v1013_v17 }
 0x4d0   :  { %v815_v53 = vpop.f32.mrb[6].mxu0 }
 0x4d1   :  { %v491_v54 = vpop.f32.mrb[7].mxu0 }
 0x4d2   :  { %v862_v55 = vpack.c.bf16 %v815_v53, %v491_v54 }
 0x4d4   :  { %863 = vmatprep.subr.bf16.mxu1 %v862_v55 }
 0x4d5   :  { %865 = vmatpush3.bf16.msra.mxu1 %v862_v55 }
 0x4d6   :  { %866 = vmatprep.subr.bf16.mxu1 %v942_v61 }
 0x4d8   :  { %821 = vmatmul.mubr.msk.f32.vlgmr.msra.gmra.mrb[4].mxu1 %vm174_vm1, %v46_v57 }
 0x4d9   :  { %868 = vmatpush3.bf16.msra.mxu1 %v867_v62  ;;  %831 = vmatprep.mubr.msk.f32.mxu1 %vm943_vm6, %v944_v13 }
 0x4da   :  { %869 = vmatprep.subr.bf16.mxu1 %v942_v61 }
 0x4dd   :  { %871 = vmatpush3.bf16.msra.mxu1 %v870_v0 }
 0x5ab   :  { %v822_v3 = vpop.f32.mrb[4].mxu1 }
 0x5ac   :  { %v582_v4 = vadd.f32 %v822_v3, %v503_v2  ;;  %v576_v5 = vpop.f32.mrb[5].mxu1 }
 0x5ad   :  { %v577_v6 = vadd.f32 %v576_v5, %v503_v2 }
 0x5ae   :  { %v586_v7 = vmax.f32 %v582_v4, 0.0 }
 0x5af   :  { %v585_v8 = vmax.f32 %v577_v6, 0.0 }
 0x5b0   :  { %v588_v9 = vsel %vm343_vm5, %v586_v7, 0.0 }
 0x5b1   :  { %v587_v10 = vsel %vm343_vm5, %v585_v8, 0.0 }
 0x5b2   :  { %v589_v11 = vadd.f32 %v588_v9, %v587_v10 }
 0x5b4   :  { %v590_v12 = vrot.slane %v589_v11, 4 }
 0x5b6   :  { %v591_v14 = vadd.f32 %v590_v12, %v589_v11 }
 0x5b8   :  { %v592_v15 = vrot.slane %v591_v14, 2 }
 0x5ba   :  { %v593_v16 = vadd.f32 %v592_v15, %v591_v14 }
 0x5bc   :  { %v594_v17 = vrot.slane %v593_v16, 1 }
 0x5be   :  { %v595_v18 = vadd.f32 %v594_v17, %v593_v16 }
 0x5c0   :  { %v597_v19 = vmul.f32 0.0625, %v595_v18 }
 0x5c2   :  { %599 = vrot.lane.b32.xlu0 %v597_v19, %s945_s2 }
 0x634   :  { %v600_v20 = vpop.permute.xlu0 %599 }
 0x635   :  { %v603_v21 = vsel %vm602_vm7, %v597_v19, %v600_v20 }
 0x636   :  { %832 = vmatmul.mubr.msk.f32.vlgmr.msra.gmra.mrb[6].mxu1 %vm171_vm2, %v603_v21 }
 0x709   :  { %v677_v24 = vpop.f32.mrb[6].mxu1 }
 0x70a   :  { %v678_v25 = vadd.f32 %v677_v24, %v607_v23  ;;  %v833_v26 = vpop.f32.mrb[7].mxu1 }
 0x70c   :  { %v682_v27 = vsel %vm681_vm8, %v678_v25, -inf }
 0x70d   :  { %v683_v28 = vrot.slane %v682_v27, 4 }
 0x70f   :  { %v684_v29 = vmax.f32 %v682_v27, %v683_v28 }
 0x711   :  { %v685_v30 = vrot.slane %v684_v29, 2 }
 0x713   :  { %v686_v31 = vmax.f32 %v684_v29, %v685_v30 }
 0x715   :  { %v687_v32 = vrot.slane %v686_v31, 1 }
 0x717   :  { %v688_v33 = vmax.f32 %v686_v31, %v687_v32 }
 0x719   :  { %v689_v34 = vsub.f32 %v678_v25, %v688_v33 }
 0x71b   :  { %v690_v35 = vmul.f32 1.442695, %v689_v34 }
 0x71d   :  { %886 = vpow2.f32 %v690_v35 }
 0x727   :  { %v887_v36 = vpop.eup %886 }
 0x728   :  { %v692_v37 = vsel %vm681_vm8, %v887_v36, 0.0 }
 0x729   :  { %v693_v39 = vrot.slane %v692_v37, 4 }
 0x72b   :  { %v694_v38 = vadd.f32 %v693_v39, %v692_v37 }
 0x72d   :  { %v695_v41 = vrot.slane %v694_v38, 2 }
 0x72f   :  { %v696_v40 = vadd.f32 %v695_v41, %v694_v38 }
 0x731   :  { %v697_v42 = vrot.slane %v696_v40, 1 }
 0x733   :  { %v698_v43 = vadd.f32 %v697_v42, %v696_v40 }
 0x735   :  { %888 = vrcp.f32 %v698_v43 }
 0x73f   :  { %v889_v44 = vpop.eup %888 }
 0x740   :  { %v700_v45 = vmul.f32 %v889_v44, %v887_v36 }
 0x742   :  { %701 = vst [vmem:[#allocation5] sm:$0x3] %v700_v45 }
 0x743   :  { %923 = shalt.err (!%p920_p12)
}
 0x744   :  { %s924_s6 = scalar_lea.hbm %s1082_s5, 32 }
 0x745   :  { %p925_p13 = scmp.ne.s32.totalorder %s1082_s5, %s924_s6  ;;  %p928_p0 = scmp.lt.u32.totalorder %s924_s6, %s1082_s5 }
 0x747   :  { %p930_p1 = pnand %p928_p0, %p925_p13 }
 0x749   :  { %933 = shalt.err (!%p930_p1)
}
 0x74a   :  { %711 = dma.vmem_to_hbm [thread:$0]  %s709_s27, 32, %s1082_s5, [#allocation4]  }
 0x74b   :  { %936 = dma.done.wait [#allocation4], 32  }
 0x74c   :  { %937 = vsyncadd [#allocation4], 4294967264 }
 0x74d   :  { %715 = vsyncpa [#allocation3], 1 }
 0x74e   :  { %716 = vsyncpa [#allocation4], 1 }

</bundles_post_ra>
